<compile_context>
chip_gen: v5e
topology: v5e:2x2
jax: 0.10.0
libtpu: 0.0.40
codegen_flags: <defaults>
</compile_context>

<pallas_src>
import jax
import jax.numpy as jnp
from jax import lax
from jax.experimental import pallas as pl
from jax.experimental.pallas import tpu as pltpu


def _pick_tile_b(B, max_tile=1024):
    """Largest sublane-aligned divisor of B <= max_tile, preferring >=2 grid steps."""
    target = min(max_tile, max(B // 2, 1))
    for t in range(target, 0, -1):          # prefer multiples of 8 (sublane aligned)
        if B % t == 0 and t % 8 == 0:
            return t
    for t in range(target, 0, -1):          # any divisor
        if B % t == 0:
            return t
    return B


def _fuse_params(params, *, gmf_dim, user_sparse_dim, item_sparse_dim,
                 user_dim, item_dim, dot_dtype):
    """Collapse deep layers + fold GMF projections into two fused weights."""
    (w1u, w1i, b1, w2, b2, wgu, bgu, wgi, bgi) = params
    H2 = w2.shape[1]

    # Deep MLP (no nonlinearity) composed into one matmul per input half.
    wd_u = w1u @ w2                                   # (Du, H2)
    wd_i = w1i @ w2                                   # (Di, H2)
    bd = b1 @ w2 + b2                                 # (1, H2)

    # GMF weights zero-padded along K so no lane slicing of the inputs is needed.
    wgu_pad = jnp.concatenate(
        [wgu, jnp.zeros((user_dim - user_sparse_dim, gmf_dim), jnp.float32)], axis=0)
    wgi_pad = jnp.concatenate(
        [wgi, jnp.zeros((item_dim - item_sparse_dim, gmf_dim), jnp.float32)], axis=0)

    # Column layout matches the output layout: [gmf | dnn].
    wu = jnp.concatenate([wgu_pad, wd_u], axis=1)     # (Du, gmf_dim + H2)
    wi = jnp.concatenate([wgi_pad, wd_i], axis=1)     # (Di, gmf_dim + H2)

    zH = jnp.zeros((1, H2), jnp.float32)
    zG = jnp.zeros((1, gmf_dim), jnp.float32)
    bias = jnp.concatenate([
        jnp.concatenate([bgu, zH], axis=1),           # row 0: user-gmf bias
        jnp.concatenate([bgi, zH], axis=1),           # row 1: item-gmf bias
        jnp.concatenate([zG, bd], axis=1),            # row 2: fused dnn bias
    ], axis=0)                                        # (3, out_dim), kept f32

    return wu.astype(dot_dtype), wi.astype(dot_dtype), bias


def ncf_forward(user_emb, item_emb, params, *, gmf_dim, user_sparse_dim,
                item_sparse_dim, tile_b=None, dot_dtype=jnp.bfloat16):
    """Fused NCF forward in one Pallas kernel, tiled over batch."""
    B, Du = user_emb.shape
    Bi, Di = item_emb.shape
    assert B == Bi
    if tile_b is None:
        tile_b = _pick_tile_b(B)
    assert B % tile_b == 0

    wu, wi, bias = _fuse_params(
        params, gmf_dim=gmf_dim, user_sparse_dim=user_sparse_dim,
        item_sparse_dim=item_sparse_dim, user_dim=Du, item_dim=Di,
        dot_dtype=dot_dtype)
    out_dim = wu.shape[1]

    # bf16 (or f32) embeddings in HBM -> halves DMA traffic on the bound path.
    user_in = user_emb.astype(dot_dtype)
    item_in = item_emb.astype(dot_dtype)

    def kernel(user_ref, item_ref, wu_ref, wi_ref, bias_ref, out_ref):
        # Two MXU matmuls per tile, f32 accumulation.
        a = jnp.dot(user_ref[...], wu_ref[...],
                    preferred_element_type=jnp.float32)   # (tile_b, out_dim)
        b = jnp.dot(item_ref[...], wi_ref[...],
                    preferred_element_type=jnp.float32)   # (tile_b, out_dim)

        bgu = bias_ref[0:1, :]
        bgi = bias_ref[1:2, :]
        bd = bias_ref[2:3, :]

        gmf = (a + bgu) * (b + bgi)       # valid on gmf columns
        dnn = a + b + bd                  # valid on dnn columns
        col = lax.broadcasted_iota(jnp.int32, a.shape, 1)
        out_ref[...] = jnp.where(col < gmf_dim, gmf, dnn).astype(out_ref.dtype)

    full = lambda arr: pl.BlockSpec(arr.shape, lambda i: (0, 0))

    return pl.pallas_call(
        kernel,
        out_shape=jax.ShapeDtypeStruct((B, out_dim), jnp.float32),
        grid_spec=pltpu.PrefetchScalarGridSpec(
            num_scalar_prefetch=0,
            grid=(B // tile_b,),
            in_specs=[
                pl.BlockSpec((tile_b, Du), lambda i: (i, 0)),   # user tile
                pl.BlockSpec((tile_b, Di), lambda i: (i, 0)),   # item tile
                full(wu), full(wi), full(bias),                 # resident weights
            ],
            out_specs=pl.BlockSpec((tile_b, out_dim), lambda i: (i, 0)),
        ),
        compiler_params=pltpu.CompilerParams(
            dimension_semantics=("parallel",)),
    )(user_in, item_in, wu, wi, bias)


def ncf_reference(user_emb, item_emb, params, *, gmf_dim, user_sparse_dim,
                  item_sparse_dim):
    (w1u, w1i, b1, w2, b2, wgu, bgu, wgi, bgi) = params
    x = jnp.concatenate([user_emb, item_emb], axis=-1)
    w1 = jnp.concatenate([w1u, w1i], axis=0)
    h = x @ w1 + b1
    dnn = h @ w2 + b2
    ug = user_emb[..., :user_sparse_dim] @ wgu + bgu
    ig = item_emb[..., :item_sparse_dim] @ wgi + bgi
    return jnp.concatenate([ug * ig, dnn], axis=-1)


if __name__ == "__main__":
    # Model config (matches NCF.__init__): hidden_dims=[48, 32, 16] -> deep layers
    # Linear(48,32), Linear(32,16); gmf_dim=16; user_sparse_dim=item_sparse_dim=16.
    B = 16
    user_dim, item_dim = 24, 24
    hidden_dims = [user_dim + item_dim, 32, 16]
    gmf_dim = 16
    user_sparse_dim = 16
    item_sparse_dim = 16

    key = jax.random.PRNGKey(0)
    ks = jax.random.split(key, 12)

    def init(k, shape, fan_in):
        bound = 1.0 / jnp.sqrt(fan_in)
        return jax.random.uniform(k, shape, jnp.float32, -bound, bound)

    # Deep layer 1: Linear(48 -> 32), weight split by user/item halves of the concat.
    w1u = init(ks[0], (user_dim, hidden_dims[1]), hidden_dims[0])
    w1i = init(ks[1], (item_dim, hidden_dims[1]), hidden_dims[0])
    b1 = init(ks[2], (1, hidden_dims[1]), hidden_dims[0])
    # Deep layer 2: Linear(32 -> 16)
    w2 = init(ks[3], (hidden_dims[1], hidden_dims[2]), hidden_dims[1])
    b2 = init(ks[4], (1, hidden_dims[2]), hidden_dims[1])
    # GMF projections
    wgu = init(ks[5], (user_sparse_dim, gmf_dim), user_sparse_dim)
    bgu = init(ks[6], (1, gmf_dim), user_sparse_dim)
    wgi = init(ks[7], (item_sparse_dim, gmf_dim), item_sparse_dim)
    bgi = init(ks[8], (1, gmf_dim), item_sparse_dim)

    params = (w1u, w1i, b1, w2, b2, wgu, bgu, wgi, bgi)

    user_emb = jax.random.normal(ks[9], (B, user_dim), jnp.float32)
    item_emb = jax.random.normal(ks[10], (B, item_dim), jnp.float32)

    ref = ncf_reference(user_emb, item_emb, params, gmf_dim=gmf_dim,
                        user_sparse_dim=user_sparse_dim,
                        item_sparse_dim=item_sparse_dim)

    # Strict check with f32 dots (only fusion-induced rounding differences).
    out_f32 = ncf_forward(user_emb, item_emb, params, gmf_dim=gmf_dim,
                          user_sparse_dim=user_sparse_dim,
                          item_sparse_dim=item_sparse_dim,
                          dot_dtype=jnp.float32)
    out_f32 = jax.block_until_ready(out_f32)
    assert out_f32.shape == (B, gmf_dim + hidden_dims[2])
    assert jnp.allclose(out_f32, ref, atol=1e-4, rtol=1e-4)

    # Default fast path: bf16 matmul inputs (f32 accumulation), relaxed tolerance.
    out_bf16 = ncf_forward(user_emb, item_emb, params, gmf_dim=gmf_dim,
                           user_sparse_dim=user_sparse_dim,
                           item_sparse_dim=item_sparse_dim)
    out_bf16 = jax.block_until_ready(out_bf16)
    assert out_bf16.shape == (B, gmf_dim + hidden_dims[2])
    assert jnp.allclose(out_bf16, ref, atol=5e-2, rtol=5e-2)

    print("KERNEL_OK")
</pallas_src>

<mosaic_0001>
module attributes {stable_mosaic.version = 11 : i64} {
  func.func @kernel(%arg0: i32, %arg1: memref<8x24xf32, #tpu.memory_space<vmem>>, %arg2: memref<8x24xf32, #tpu.memory_space<vmem>>, %arg3: memref<24x32xf32, #tpu.memory_space<vmem>>, %arg4: memref<24x32xf32, #tpu.memory_space<vmem>>, %arg5: memref<3x32xf32, #tpu.memory_space<vmem>>, %arg6: memref<8x32xf32, #tpu.memory_space<vmem>>) attributes {dimension_semantics = [#tpu.dimension_semantics<parallel>], iteration_bounds = array<i64: 2>, scalar_prefetch = 0 : i64, scratch_operands = 0 : i64, tpu.core_type = #tpu.core_type<tc>, window_params = [{transform_indices = @transform_0, window_bounds = array<i64: 8, 24>}, {transform_indices = @transform_1, window_bounds = array<i64: 8, 24>}, {pipeline_mode = #tpu.pipeline_mode<synchronous>, transform_indices = @transform_2, window_bounds = array<i64: 24, 32>}, {pipeline_mode = #tpu.pipeline_mode<synchronous>, transform_indices = @transform_3, window_bounds = array<i64: 24, 32>}, {pipeline_mode = #tpu.pipeline_mode<synchronous>, transform_indices = @transform_4, window_bounds = array<i64: 3, 32>}, {transform_indices = @transform_5, window_bounds = array<i64: 8, 32>}]} {
    %c0 = arith.constant 0 : index
    %c0_0 = arith.constant 0 : index
    %0 = vector.load %arg1[%c0, %c0_0] : memref<8x24xf32, #tpu.memory_space<vmem>>, vector<8x24xf32>
    %c0_1 = arith.constant 0 : index
    %c0_2 = arith.constant 0 : index
    %1 = vector.load %arg3[%c0_1, %c0_2] : memref<24x32xf32, #tpu.memory_space<vmem>>, vector<24x32xf32>
    %cst = arith.constant dense<0.000000e+00> : vector<8x32xf32>
    %2 = tpu.matmul %0, %1, %cst {dimension_numbers = #tpu.dot_dimension_numbers<[1], [0], [0], [1], [0, 0, 1, 1], [], []>} : vector<8x24xf32>, vector<24x32xf32>, vector<8x32xf32> -> vector<8x32xf32>
    %c0_3 = arith.constant 0 : index
    %c0_4 = arith.constant 0 : index
    %3 = vector.load %arg2[%c0_3, %c0_4] : memref<8x24xf32, #tpu.memory_space<vmem>>, vector<8x24xf32>
    %c0_5 = arith.constant 0 : index
    %c0_6 = arith.constant 0 : index
    %4 = vector.load %arg4[%c0_5, %c0_6] : memref<24x32xf32, #tpu.memory_space<vmem>>, vector<24x32xf32>
    %cst_7 = arith.constant dense<0.000000e+00> : vector<8x32xf32>
    %5 = tpu.matmul %3, %4, %cst_7 {dimension_numbers = #tpu.dot_dimension_numbers<[1], [0], [0], [1], [0, 0, 1, 1], [], []>} : vector<8x24xf32>, vector<24x32xf32>, vector<8x32xf32> -> vector<8x32xf32>
    %c0_8 = arith.constant 0 : index
    %c0_9 = arith.constant 0 : index
    %6 = vector.load %arg5[%c0_8, %c0_9] : memref<3x32xf32, #tpu.memory_space<vmem>>, vector<1x32xf32>
    %c1 = arith.constant 1 : index
    %c0_10 = arith.constant 0 : index
    %7 = vector.load %arg5[%c1, %c0_10] : memref<3x32xf32, #tpu.memory_space<vmem>>, vector<1x32xf32>
    %c2 = arith.constant 2 : index
    %c0_11 = arith.constant 0 : index
    %8 = vector.load %arg5[%c2, %c0_11] : memref<3x32xf32, #tpu.memory_space<vmem>>, vector<1x32xf32>
    %9 = vector.broadcast %6 : vector<1x32xf32> to vector<8x32xf32>
    %10 = arith.addf %2, %9 : vector<8x32xf32>
    %11 = vector.broadcast %7 : vector<1x32xf32> to vector<8x32xf32>
    %12 = arith.addf %5, %11 : vector<8x32xf32>
    %13 = arith.mulf %10, %12 : vector<8x32xf32>
    %14 = arith.addf %2, %5 : vector<8x32xf32>
    %15 = vector.broadcast %8 : vector<1x32xf32> to vector<8x32xf32>
    %16 = arith.addf %14, %15 : vector<8x32xf32>
    %17 = tpu.iota {dimensions = array<i32: 1>} : vector<8x32xi32>
    %c16_i32 = arith.constant 16 : i32
    %18 = vector.broadcast %c16_i32 : i32 to vector<8x32xi32>
    %19 = arith.cmpi slt, %17, %18 : vector<8x32xi32>
    %20 = arith.select %19, %13, %16 : vector<8x32xi1>, vector<8x32xf32>
    %c0_12 = arith.constant 0 : index
    %c0_13 = arith.constant 0 : index
    %21 = vector.load %arg6[%c0_12, %c0_13] : memref<8x32xf32, #tpu.memory_space<vmem>>, vector<8x32xf32>
    tpu.vector_store %arg6[%c0_12, %c0_13], %20 {strides = array<i32>} : memref<8x32xf32, #tpu.memory_space<vmem>>, vector<8x32xf32>,
    return
  }
  func.func @transform_0(%arg0: i32) -> (i32, i32) {
    %c0_i32 = arith.constant 0 : i32
    %c0_i32_0 = arith.constant 0 : i32
    return %arg0, %c0_i32 : i32, i32
  }
  func.func @transform_1(%arg0: i32) -> (i32, i32) {
    %c0_i32 = arith.constant 0 : i32
    %c0_i32_0 = arith.constant 0 : i32
    return %arg0, %c0_i32 : i32, i32
  }
  func.func @transform_2(%arg0: i32) -> (i32, i32) {
    %c0_i32 = arith.constant 0 : i32
    %c0_i32_0 = arith.constant 0 : i32
    %c0_i32_1 = arith.constant 0 : i32
    return %c0_i32, %c0_i32_0 : i32, i32
  }
  func.func @transform_3(%arg0: i32) -> (i32, i32) {
    %c0_i32 = arith.constant 0 : i32
    %c0_i32_0 = arith.constant 0 : i32
    %c0_i32_1 = arith.constant 0 : i32
    return %c0_i32, %c0_i32_0 : i32, i32
  }
  func.func @transform_4(%arg0: i32) -> (i32, i32) {
    %c0_i32 = arith.constant 0 : i32
    %c0_i32_0 = arith.constant 0 : i32
    %c0_i32_1 = arith.constant 0 : i32
    return %c0_i32, %c0_i32_0 : i32, i32
  }
  func.func @transform_5(%arg0: i32) -> (i32, i32) {
    %c0_i32 = arith.constant 0 : i32
    %c0_i32_0 = arith.constant 0 : i32
    return %arg0, %c0_i32 : i32, i32
  }
}

</mosaic_0001>

<bundles_post_ra>
// kernel: tpu_custom_call.1
= control target key start
LH: loop header
LB: loop body
LE: loop exit
PB: predicated region body
PF: predicated region fallthrough
CT: control target
= control target key end

     0   :  { %s1102_s0 = inlined_call_operand.hbm [shape: f32[16,24], index: 0, kind: input, shape index: {}]   ;;  %s1103_s1 = inlined_call_operand.hbm [shape: f32[16,24], index: 1, kind: input, shape index: {}]   ;;  %s1104_s2 = inlined_call_operand.hbm [shape: f32[24,32], index: 2, kind: input, shape index: {}]   ;;  %s1105_s3 = inlined_call_operand.hbm [shape: f32[24,32], index: 3, kind: input, shape index: {}]   ;;  %s1106_s4 = inlined_call_operand.hbm [shape: f32[3,32], index: 4, kind: input, shape index: {}]   ;;  %s1107_s5 = inlined_call_operand.hbm [shape: f32[16,32], index: 5, kind: output, shape index: {}]  }
   0x1   :  { %1108 = sst [smem:[#allocation18_spill]] %s1104_s2 }
   0x2   :  { %1109 = sst [smem:[#allocation19_spill]] %s1105_s3 }
   0x3   :  { %1110 = sst [smem:[#allocation20_spill]] %s1106_s4 }
   0x4   :  { %10 = vsyncpa [#allocation3], 0 }
   0x5   :  { %12 = vsyncpa [#allocation3 + $0x1], 0 }
   0x6   :  { %13 = vsyncpa [#allocation6], 0 }
   0x7   :  { %15 = vsyncpa [#allocation6 + $0x1], 0 }
   0x8   :  { %16 = vsyncpa [#allocation9], 0 }
   0x9   :  { %17 = vsyncpa [#allocation4], 0 }
   0xa   :  { %19 = vsyncpa [#allocation4 + $0x1], 0  ;;  %s912_s18 = smov 0   ;;  %s914_s19 = smov 0  }
   0xb   :  { %s916_s20 = smov 0   ;;  %s918_s21 = smov 0  }
   0xc LB: > { %s1111_s2 = sld [smem:[#allocation18_spill]]  ;;  %s936_s25 = sadd.s32 4294967295, %s875_s21   ;;  %s875_s21 = sphi %s918_s21, %s1127_s21   ;;  %s871_s20 = sphi %s916_s20, %s1126_s20   ;;  %s867_s19 = sphi %s914_s19, %s1125_s19   ;;  %s863_s18 = sphi %s912_s18, %s1124_s18  }
   0xd   : > { %p538_p0 = scmp.ge.s32.totalorder %s875_s21, 1  ;;  %p46_p1 = scmp.eq.s32.totalorder %s936_s25, 0 }
   0xe   : > { %p171_p2 = scmp.lt.s32.totalorder %s875_s21, 3  ;;  %s877_s27 = smov [#allocation7]  }
   0xf   : > { %s184_s28 = sshll.u32 %s877_s27, 4  ;;  %s1113_s3 = sld [smem:[#allocation19_spill]]  ;;  %s185_s28 = int_to_ptr.vmem [resolvable:$true] %s184_s28 }
  0x10   : > { %p941_p3 = pnand %p538_p0, %p171_p2  ;;  %s1115_s4 = sld [smem:[#allocation20_spill]] }
  0x11   : > { %s878_s11 = smov [#allocation8]   ;;  %s879_s13 = smov 128  }
  0x12   : > { %s182_s24 = sshll.u32 %s1111_s2, 4  ;;  %p578_p4 = pneg %p941_p3  ;;  %s183_s24 = int_to_ptr.hbm [resolvable:$true] %s182_s24 }
  0x13   : > { %s198_s12 = sshll.u32 %s878_s11, 4  ;;  %s880_s14 = smov 8   ;;  %s199_s12 = int_to_ptr.vmem [resolvable:$true] %s198_s12 }
  0x14   : > { %p953_p6 = pnand %p578_p4, %p46_p1  ;;  %s881_s15 = smov [#allocation10]  }
  0x15   : > { %s196_s6 = sshll.u32 %s1113_s3, 4  ;;  %s213_s16 = sshll.u32 %s881_s15, 4  ;;  %s197_s6 = int_to_ptr.hbm [resolvable:$true] %s196_s6  ;;  %s214_s16 = int_to_ptr.vmem [resolvable:$true] %s213_s16 }
  0x16   : > { %s211_s10 = sshll.u32 %s1115_s4, 4  ;;  %s537_s17 = sadd.s32 4294967294, %s875_s21   ;;  %s212_s10 = int_to_ptr.hbm [resolvable:$true] %s211_s10 }
  0x17   : > { %581 = dma.hbm_to_vmem [thread:$0]  (!%p953_p6), %s183_s24, 384, %s185_s28, [#allocation6], %s879_s13, %s879_s13, %s880_s14  }
  0x18   : > { %584 = dma.hbm_to_vmem [thread:$0]  (!%p953_p6), %s197_s6, 384, %s199_s12, [#allocation9], %s879_s13, %s879_s13, %s880_s14  }
  0x19   : > { %587 = dma.hbm_to_vmem [thread:$0]  (!%p953_p6), %s212_s10, 64, %s214_s16, [#allocation9]  }
  0x1a   : > { %s968_s22 = sadd.s32 1, %s875_s21   ;;  %s32_s23 = sadd.s32 1, %s871_s20 }
  0x1b   : > { %s29_s24 = ssub.s32 %s875_s21, %s968_s22  ;;  %p39_p7 = scmp.ne.s32.totalorder %s871_s20, %s867_s19 }
  0x1c   : > { %p30_p8 = scmp.eq.s32.totalorder %s29_s24, 0  ;;  %p40_p9 = scmp.eq.s32.totalorder %s875_s21, 0 }
  0x1d   : > { %p45_p10 = scmp.ne.s32.totalorder %s867_s19, %s863_s18  ;;  %p158_p11 = scmp.eq.s32.totalorder %s936_s25, 1 }
  0x1e   : > { %s980_s27 = scalar_select %p30_p8, %s871_s20, %s32_s23  }
  0x1f   : > { %p982_p12 = por %p40_p9, %p39_p7  ;;  %p988_p13 = por %p46_p1, %p45_p10 }
  0x20   : > { %1116 = sst [smem:[#allocation17_spill]] %s980_s27  ;;  %p992_p0 = por %p158_p11, %p39_p7 }
  0x21   : > { %p164_p2 = scmp.eq.s32.totalorder %s537_s17, 1  ;;  %p602_p4 = scmp.lt.s32.totalorder %s875_s21, 2 }
  0x22   : > { %s224_s6 = sand.u32 1, %s871_s20   ;;  %s544_s9 = sshll.u32 %s875_s21, 3 }
  0x23   : > { %p998_p6 = por %p164_p2, %p45_p10  ;;  %s543_s8 = sshll.u32 %s224_s6, 3 }
  0x24   : > { %s232_s12 = scalar_lea.hbm %s1102_s0, %s544_s9  ;;  %s228_s14 = scalar_lea.vmem [#allocation2], %s543_s8 }
  0x25   : > { %s234_s13 = sshll.u32 %s232_s12, 4  ;;  %s236_s15 = sshll.u32 %s228_s14, 4  ;;  %s235_s13 = int_to_ptr.hbm [resolvable:$true] %s234_s13  ;;  %s237_s15 = int_to_ptr.vmem [resolvable:$true] %s236_s15 }
  0x26   : > { %p1008_p7 = pnand %p602_p4, %p982_p12  ;;  %s251_s24 = scalar_lea.hbm %s1103_s1, %s544_s9 }
  0x27   : > { %s243_s2 = sand.u32 1, %s875_s21   ;;  %s225_s3 = scalar_lea.sflag [#allocation3], %s224_s6 }
  0x28   : > { %s737_s10 = sshra.s32 %s235_s13, 4  ;;  %p741_p9 = pneg %p1008_p7  ;;  %s738_s10 = int_to_ptr.hbm [resolvable:$true] %s737_s10 }
  0x29   : > { %s739_s11 = scalar_lea.hbm %s738_s10, 8  ;;  %s744_s14 = scalar_lea.hbm %s1102_s0, 16 }
  0x2a   : > { %p740_p8 = scmp.ne.s32.totalorder %s738_s10, %s739_s11  ;;  %p745_p12 = scmp.lt.s32.totalorder %s738_s10, %s1102_s0 }
  0x2b   : > { %p746_p2 = scmp.lt.s32.totalorder %s744_s14, %s739_s11 }
  0x2c   : > { %p742_p10 = pnand %p741_p9, %p740_p8 }
  0x2d   : > { %p747_p4 = por %p746_p2, %p745_p12 }
  0x2e   : > { %p743_p11 = pneg %p742_p10 }
  0x30   : > { %p748_p5 = pnand %p747_p4, %p743_p11 }
  0x32   : > { %751 = shalt.err (!%p748_p5)
}
  0x33   : > { %591 = dma.hbm_to_vmem [thread:$0]  (!%p1008_p7), %s235_s13, 128, %s237_s15, %s225_s3  }
  0x34   : > { %s253_s6 = sshll.u32 %s251_s24, 4  ;;  %s247_s9 = scalar_lea.vmem [#allocation5], %s543_s8  ;;  %s254_s6 = int_to_ptr.hbm [resolvable:$true] %s253_s6 }
  0x35   : > { %s255_s4 = sshll.u32 %s247_s9, 4  ;;  %s244_s27 = scalar_lea.sflag [#allocation6], %s243_s2  ;;  %s256_s4 = int_to_ptr.vmem [resolvable:$true] %s255_s4 }
  0x36   : > { %s767_s28 = sshra.s32 %s254_s6, 4  ;;  %s774_s14 = scalar_lea.hbm %s1103_s1, 16  ;;  %s768_s28 = int_to_ptr.hbm [resolvable:$true] %s767_s28 }
  0x37   : > { %s769_s12 = scalar_lea.hbm %s768_s28, 8  ;;  %p775_p5 = scmp.lt.s32.totalorder %s768_s28, %s1103_s1 }
  0x38   : > { %p770_p8 = scmp.ne.s32.totalorder %s768_s28, %s769_s12  ;;  %p776_p11 = scmp.lt.s32.totalorder %s774_s14, %s769_s12 }
  0x3a   : > { %p772_p10 = pnand %p770_p8, %p741_p9  ;;  %p777_p2 = por %p776_p11, %p775_p5 }
  0x3c   : > { %p773_p12 = pneg %p772_p10 }
  0x3e   : > { %p778_p4 = pnand %p777_p2, %p773_p12 }
  0x40   : > { %781 = shalt.err (!%p778_p4)
}
  0x41   : > { %594 = dma.hbm_to_vmem [thread:$0]  (!%p1008_p7), %s254_s6, 128, %s256_s4, %s244_s27  }
  0x42   : > { %264 = sbr.rel (%p941_p3) target bundleno = 219 (0xdb), region = 40  ;;  %s1043_s2 = sand.u32 (!%p941_p3), 1, %s867_s19  }
  0x43   : > { %s1046_s8 = sshll.u32 (!%p941_p3), %s1043_s2, 3  ;;  %s267_s13 = scalar_lea.sflag (!%p941_p3), [#allocation3], %s1043_s2 }
  0x44   : > { %s270_s15 = scalar_lea.vmem (!%p941_p3), [#allocation2], %s1046_s8 }
  0x47   : > { %842 = dma.done.wait (%p988_p13), %s267_s13, 128  }
  0x48   : > { %844 = vsyncadd (%p988_p13), %s267_s13, 4294967168  ;;  %s276_s4 = sand.u32 1, %s936_s25   ;;  %s280_s27 = scalar_lea.vmem [#allocation5], %s1046_s8 }
  0x49   : > { %s277_s26 = scalar_lea.sflag [#allocation6], %s276_s4 }
  0x4a   : > { %846 = dma.done.wait (%p988_p13), %s277_s26, 128  }
  0x4b   : > { %848 = vsyncadd (%p988_p13), %s277_s26, 4294967168 }
  0x4c   : > { %850 = dma.done.wait (%p46_p1), [#allocation6], 384  }
  0x4d   : > { %852 = vsyncadd (%p46_p1), [#allocation6], 4294966912 }
  0x4e   : > { %854 = dma.done.wait (%p46_p1), [#allocation9], 448  }
  0x4f   : > { %856 = vsyncadd (%p46_p1), [#allocation9], 4294966848  ;;  %v331_v0 = vld [vmem:[#allocation7 + $0x10] sm:$0xff]  ;;  %v359_v1 = vld [vmem:[#allocation8 + $0x10] sm:$0xff]  ;;  %vm332_vm0 = vcmask 195584   ;;  %v394_v8 = vlaneseq  ;;  %s557_s29 = sshll.u32 %s936_s25, 3 }
  0x50   : > { %v330_v2 = vld [vmem:[#allocation7 + $0x8] sm:$0xff]  ;;  %349 = vmatpush.msra.mxu0 %v331_v0  ;;  %376 = vmatpush.msra.mxu1 %v359_v1  ;;  %v358_v3 = vld [vmem:[#allocation8 + $0x8] sm:$0xff]  ;;  %v357_v5 = vld [vmem:[#allocation8] sm:$0xff]  ;;  %s411_s23 = scalar_lea.hbm %s1107_s5, %s557_s29  ;;  %s327_s6 = scalar_lea.vmem [#allocation11], %s1046_s8  ;;  %vm398_vm2 = vcmask 261120  }
  0x51   : > { %v329_v4 = vld [vmem:[#allocation7] sm:$0xff]  ;;  %v356_v7 = vld [vmem:[%s280_s27] sm:$0xff]  ;;  %v395_v11 = vand.u32 127, %v394_v8  ;;  %s413_s9 = sshll.u32 %s327_s6, 4  ;;  %s415_s28 = sshll.u32 %s411_s23, 4  ;;  %s414_s9 = int_to_ptr.vmem [resolvable:$true] %s413_s9  ;;  %s416_s28 = int_to_ptr.hbm [resolvable:$true] %s415_s28 }
  0x52   : > { %v328_v6 = vld [vmem:[%s270_s15] sm:$0xff]  ;;  %350 = vmatpush.msra.mxu0 %v330_v2  ;;  %377 = vmatpush.msra.mxu1 %v358_v3  ;;  %v644_v9 = vld [vmem:[#allocation10] ss:$0 sm:$0xff]  ;;  %v645_v10 = vld [vmem:[#allocation10 + $0x1] ss:$0 sm:$0xff]  ;;  %s401_s25 = scalar_lea.sflag [#allocation4], %s1043_s2 }
  0x53   : > { %v646_v12 = vld [vmem:[#allocation10 + $0x2] ss:$0 sm:$0xff]  ;;  %vm396_vm1 = vcmp.lt.s32.totalorder %v395_v11, 16  ;;  %s811_s12 = sshra.s32 %s416_s28, 4  ;;  %s817_s17 = scalar_lea.hbm %s1107_s5, 16  ;;  %s812_s12 = int_to_ptr.hbm [resolvable:$true] %s811_s12 }
  0x54   : > { %351 = vmatpush.msra.mxu0 %v329_v4  ;;  %378 = vmatpush.msra.mxu1 %v357_v5  ;;  %s813_s10 = scalar_lea.hbm %s812_s12, 8  ;;  %p818_p7 = scmp.lt.s32.totalorder %s812_s12, %s1107_s5 }
  0x55   : > { %554 = vmatmul.msk.f32.vlgmr.msra.gmra.mxu0 %vm332_vm0, %v328_v6  ;;  %555 = vmatmul.msk.f32.vlgmr.msra.gmra.mxu1 %vm332_vm0, %v356_v7  ;;  %p814_p1 = scmp.ne.s32.totalorder %s812_s12, %s813_s10  ;;  %p819_p9 = scmp.lt.s32.totalorder %s817_s17, %s813_s10 }
  0x57   : > { %p815_p3 = pnand %p814_p1, %p992_p0  ;;  %p820_p8 = por %p819_p9, %p818_p7 }
  0x59   : > { %p816_p13 = pneg %p815_p3 }
  0x5b   : > { %p821_p10 = pnand %p820_p8, %p816_p13 }
  0xd2   : > { %v353_v13 = vpop.f32.mrf.mxu0  ;;  %v380_v14 = vpop.f32.mrf.mxu1 }
  0xd3   : > { %v387_v15 = vadd.f32 %v644_v9, %v353_v13  ;;  %v389_v16 = vadd.f32 %v645_v10, %v380_v14  ;;  %v391_v17 = vadd.f32 %v380_v14, %v353_v13 }
  0xd5   : > { %v390_v18 = vmul.f32 %v389_v16, %v387_v15  ;;  %v393_v19 = vadd.f32 %v646_v12, %v391_v17 }
  0xd7   : > { %v397_v20 = vsel %vm396_vm1, %v390_v18, %v393_v19 }
  0xd8   : > { %399 = vst.msk [vmem:[%s327_s6] sm:$0xff] %vm398_vm2, %v397_v20 }
  0xd9   : > { %824 = shalt.err (!%p821_p10)
}
  0xda   : > { %576 = dma.vmem_to_hbm [thread:$0]  (%p992_p0), %s414_s9, 128, %s416_s28, %s401_s25  }
  0xdb PF: > { %s427_s2 = sand.u32 1, %s863_s18   ;;  %p1122_p12 = scmp.ge.s32.totalorder %s875_s21, 2 }
  0xdc   : > { %s428_s13 = scalar_lea.sflag [#allocation4], %s427_s2 }
  0xdd   : > { %p596_p5 = pnand %p1122_p12, %p998_p6 }
  0xdf   : > { %p597_p11 = pneg %p596_p5 }
  0xe1   : > { %858 = dma.done.wait (%p597_p11), %s428_s13, 128  }
  0xe2   : > { %860 = vsyncadd (%p597_p11), %s428_s13, 4294967168  ;;  %s1123_s15 = sld [smem:[#allocation17_spill]]  ;;  %p22_p2 = scmp.ge.s32.totalorder %s968_s22, 4  }
  0xe3   : > { %s1124_s18 = smov %s867_s19  ;;  %s1125_s19 = smov %s871_s20 }
  0xe4   : > { %s1127_s21 = smov %s968_s22  ;;  %24 = sbr.rel (!%p22_p2) target bundleno = 12 (0xc), region = 110 }
  0xe8   : > { %s1126_s20 = smov %s1123_s15 }
  0xe9   :  { %434 = vsyncpa [#allocation3], 1 }
  0xea   :  { %436 = vsyncpa [#allocation3 + $0x1], 1 }
  0xeb   :  { %437 = vsyncpa [#allocation6], 1 }
  0xec   :  { %439 = vsyncpa [#allocation6 + $0x1], 1 }
  0xed   :  { %440 = vsyncpa [#allocation9], 1 }
  0xee   :  { %441 = vsyncpa [#allocation4], 1 }
  0xef   :  { %443 = vsyncpa [#allocation4 + $0x1], 1 }

</bundles_post_ra>
